<compile_context>
chip_gen: v7x
topology: tpu7x:2x2x1
jax: 0.10.0
libtpu: 0.0.40
codegen_flags: <defaults>
</compile_context>

<pallas_src>
import functools

import jax
import jax.numpy as jnp
from jax import lax
from jax.experimental import pallas as pl
from jax.experimental.pallas import tpu as pltpu


# ----------------------------- Pallas kernel ------------------------------- #

def _make_fused_mlp_kernel(n_hidden):
    """Build a fused kernel for `n_hidden` (Linear->BN->ReLU->Dropout) blocks
    followed by a final Linear + ReLU-on-column-0."""

    def kernel(*refs):
        # refs layout:
        #   x,
        #   [w_t, b, gamma, beta, drop_mask] * n_hidden,
        #   w_final_t, b_final,
        #   out
        idx = 0
        h = refs[idx][...]
        idx += 1

        for _ in range(n_hidden):
            w_ref, b_ref, g_ref, be_ref, m_ref = refs[idx:idx + 5]
            idx += 5

            # Linear: y = h @ W^T + b   (MXU, f32 accumulate)
            y = jnp.dot(h, w_ref[...], preferred_element_type=jnp.float32) + b_ref[...]

            # BatchNorm1d (training mode): one-pass batch mean / biased variance.
            mean = jnp.mean(y, axis=0, keepdims=True)
            var = jnp.mean(y * y, axis=0, keepdims=True) - mean * mean
            var = jnp.maximum(var, 0.0)  # guard tiny negative from cancellation
            y = (y - mean) * lax.rsqrt(var + 1e-5)
            y = y * g_ref[...] + be_ref[...]

            # ReLU
            y = jnp.maximum(y, 0.0)

            # Dropout (train, p=0.5, inverted): mask holds 0.0 or 2.0.
            h = y * m_ref[...]

        w_ref, b_ref = refs[idx:idx + 2]
        idx += 2
        out_ref = refs[idx]

        # Final Linear, then ReLU applied only to column 0 (torch.cat trick).
        y = jnp.dot(h, w_ref[...], preferred_element_type=jnp.float32) + b_ref[...]
        col = lax.broadcasted_iota(jnp.int32, y.shape, 1)
        out_ref[...] = jnp.where(col == 0, jnp.maximum(y, 0.0), y)

    return kernel


# ------------------------------ JAX wrapper --------------------------------- #

_VMEM = pl.BlockSpec(memory_space=pltpu.MemorySpace.VMEM)


@jax.jit
def simple_neural_network_forward(x, params, dropout_key):
    """Forward pass matching SimpleNeuralNetwork.forward (separate=False).

    x:       [B, D0] float
    params:  list of (w_t [Din,Dout], b [1,Dout], gamma [1,Dout] | None, beta | None);
             last entry is the final Linear (gamma/beta None).
    dropout_key: jax PRNG key for the per-call dropout masks.
    """
    x = x.astype(jnp.float32)
    B = x.shape[0]

    hidden_params = params[:-1]
    w_fin, b_fin, _, _ = params[-1]
    n_hidden = len(hidden_params)

    inputs = [x]
    keys = jax.random.split(dropout_key, max(n_hidden, 1))
    for (w_t, b, gamma, beta), k in zip(hidden_params, keys):
        keep = jax.random.bernoulli(k, 0.5, (B, w_t.shape[1]))
        drop_mask = keep.astype(jnp.float32) * 2.0  # inverted dropout scale 1/(1-p)
        inputs += [w_t, b, gamma, beta, drop_mask]
    inputs += [w_fin, b_fin]

    out_shape = jax.ShapeDtypeStruct((B, w_fin.shape[1]), jnp.float32)

    return pl.pallas_call(
        _make_fused_mlp_kernel(n_hidden),
        out_shape=out_shape,
        in_specs=[_VMEM] * len(inputs),
        out_specs=_VMEM,
    )(*inputs)


def init_params(key, dims):
    """Deterministic parameter init mirroring nn.Linear / nn.BatchNorm1d shapes.

    dims = (d0, d1, ..., dL): Linear(d_i, d_{i+1}) per pair; BatchNorm1d for every
    hidden width.  Linear weights are stored pre-transposed as [in, out].
    """
    params = []
    for i, (din, dout) in enumerate(zip(dims[:-1], dims[1:])):
        key, kw, kb = jax.random.split(key, 3)
        bound = 1.0 / jnp.sqrt(jnp.float32(din))
        w_t = jax.random.uniform(kw, (din, dout), jnp.float32, -bound, bound)
        b = jax.random.uniform(kb, (1, dout), jnp.float32, -bound, bound)
        is_hidden = i < len(dims) - 2
        gamma = jnp.ones((1, dout), jnp.float32) if is_hidden else None
        beta = jnp.zeros((1, dout), jnp.float32) if is_hidden else None
        params.append((w_t, b, gamma, beta))
    return params


# --------------------------------- main ------------------------------------- #

if __name__ == "__main__":
    # SimpleNeuralNetwork(16, 32, 32, 4) -> Linear(16,32), Linear(32,32), Linear(32,4)
    dims = (16, 32, 32, 4)
    batch = 8  # >= 2 required by train-mode BatchNorm; aligns with 8 sublanes

    key = jax.random.PRNGKey(0)
    key, kx, kparams, kdrop = jax.random.split(key, 4)
    x = jax.random.normal(kx, (batch, dims[0]), jnp.float32)
    params = init_params(kparams, dims)

    out = simple_neural_network_forward(x, params, kdrop)
    out = jax.block_until_ready(out)

    assert out.shape == (batch, dims[-1]), out.shape
    assert out.dtype == jnp.float32
    assert bool(jnp.all(jnp.isfinite(out)))
    # Column 0 must be non-negative (ReLU applied only to the first column).
    assert bool(jnp.all(out[:, 0] >= 0.0))

    print("KERNEL_OK")
</pallas_src>

<mosaic_0001>
module attributes {stable_mosaic.version = 11 : i64} {
  func.func @kernel(%arg0: memref<8x16xf32, #tpu.memory_space<vmem>>, %arg1: memref<16x32xf32, #tpu.memory_space<vmem>>, %arg2: memref<1x32xf32, #tpu.memory_space<vmem>>, %arg3: memref<1x32xf32, #tpu.memory_space<vmem>>, %arg4: memref<1x32xf32, #tpu.memory_space<vmem>>, %arg5: memref<8x32xf32, #tpu.memory_space<vmem>>, %arg6: memref<32x32xf32, #tpu.memory_space<vmem>>, %arg7: memref<1x32xf32, #tpu.memory_space<vmem>>, %arg8: memref<1x32xf32, #tpu.memory_space<vmem>>, %arg9: memref<1x32xf32, #tpu.memory_space<vmem>>, %arg10: memref<8x32xf32, #tpu.memory_space<vmem>>, %arg11: memref<32x4xf32, #tpu.memory_space<vmem>>, %arg12: memref<1x4xf32, #tpu.memory_space<vmem>>, %arg13: memref<8x4xf32, #tpu.memory_space<vmem>>) attributes {dimension_semantics = [], scalar_prefetch = 0 : i64, scratch_operands = 0 : i64, tpu.core_type = #tpu.core_type<tc>} {
    %c0 = arith.constant 0 : index
    %c0_0 = arith.constant 0 : index
    %0 = vector.load %arg0[%c0, %c0_0] : memref<8x16xf32, #tpu.memory_space<vmem>>, vector<8x16xf32>
    %c0_1 = arith.constant 0 : index
    %c0_2 = arith.constant 0 : index
    %1 = vector.load %arg1[%c0_1, %c0_2] : memref<16x32xf32, #tpu.memory_space<vmem>>, vector<16x32xf32>
    %cst = arith.constant dense<0.000000e+00> : vector<8x32xf32>
    %2 = tpu.matmul %0, %1, %cst {dimension_numbers = #tpu.dot_dimension_numbers<[1], [0], [0], [1], [0, 0, 1, 1], [], []>} : vector<8x16xf32>, vector<16x32xf32>, vector<8x32xf32> -> vector<8x32xf32>
    %c0_3 = arith.constant 0 : index
    %c0_4 = arith.constant 0 : index
    %3 = vector.load %arg2[%c0_3, %c0_4] : memref<1x32xf32, #tpu.memory_space<vmem>>, vector<1x32xf32>
    %4 = vector.broadcast %3 : vector<1x32xf32> to vector<8x32xf32>
    %5 = arith.addf %2, %4 : vector<8x32xf32>
    %cst_5 = arith.constant dense<0.000000e+00> : vector<32xf32>
    %6 = vector.multi_reduction <add>, %5, %cst_5 [0] : vector<8x32xf32> to vector<32xf32>
    %7 = vector.shape_cast %6 : vector<32xf32> to vector<1x32xf32>
    %cst_6 = arith.constant 8.000000e+00 : f32
    %8 = vector.broadcast %cst_6 : f32 to vector<1x32xf32>
    %9 = arith.divf %7, %8 : vector<1x32xf32>
    %10 = arith.mulf %5, %5 : vector<8x32xf32>
    %cst_7 = arith.constant dense<0.000000e+00> : vector<32xf32>
    %11 = vector.multi_reduction <add>, %10, %cst_7 [0] : vector<8x32xf32> to vector<32xf32>
    %12 = vector.shape_cast %11 : vector<32xf32> to vector<1x32xf32>
    %cst_8 = arith.constant 8.000000e+00 : f32
    %13 = vector.broadcast %cst_8 : f32 to vector<1x32xf32>
    %14 = arith.divf %12, %13 : vector<1x32xf32>
    %15 = arith.mulf %9, %9 : vector<1x32xf32>
    %16 = arith.subf %14, %15 : vector<1x32xf32>
    %cst_9 = arith.constant 0.000000e+00 : f32
    %17 = vector.broadcast %cst_9 : f32 to vector<1x32xf32>
    %18 = arith.maximumf %16, %17 : vector<1x32xf32>
    %19 = vector.broadcast %9 : vector<1x32xf32> to vector<8x32xf32>
    %20 = arith.subf %5, %19 : vector<8x32xf32>
    %cst_10 = arith.constant 9.99999974E-6 : f32
    %21 = vector.broadcast %cst_10 : f32 to vector<1x32xf32>
    %22 = arith.addf %18, %21 : vector<1x32xf32>
    %23 = math.rsqrt %22 : vector<1x32xf32>
    %24 = vector.broadcast %23 : vector<1x32xf32> to vector<8x32xf32>
    %25 = arith.mulf %20, %24 : vector<8x32xf32>
    %c0_11 = arith.constant 0 : index
    %c0_12 = arith.constant 0 : index
    %26 = vector.load %arg3[%c0_11, %c0_12] : memref<1x32xf32, #tpu.memory_space<vmem>>, vector<1x32xf32>
    %27 = vector.broadcast %26 : vector<1x32xf32> to vector<8x32xf32>
    %28 = arith.mulf %25, %27 : vector<8x32xf32>
    %c0_13 = arith.constant 0 : index
    %c0_14 = arith.constant 0 : index
    %29 = vector.load %arg4[%c0_13, %c0_14] : memref<1x32xf32, #tpu.memory_space<vmem>>, vector<1x32xf32>
    %30 = vector.broadcast %29 : vector<1x32xf32> to vector<8x32xf32>
    %31 = arith.addf %28, %30 : vector<8x32xf32>
    %cst_15 = arith.constant 0.000000e+00 : f32
    %32 = vector.broadcast %cst_15 : f32 to vector<8x32xf32>
    %33 = arith.maximumf %31, %32 : vector<8x32xf32>
    %c0_16 = arith.constant 0 : index
    %c0_17 = arith.constant 0 : index
    %34 = vector.load %arg5[%c0_16, %c0_17] : memref<8x32xf32, #tpu.memory_space<vmem>>, vector<8x32xf32>
    %35 = arith.mulf %33, %34 : vector<8x32xf32>
    %c0_18 = arith.constant 0 : index
    %c0_19 = arith.constant 0 : index
    %36 = vector.load %arg6[%c0_18, %c0_19] : memref<32x32xf32, #tpu.memory_space<vmem>>, vector<32x32xf32>
    %cst_20 = arith.constant dense<0.000000e+00> : vector<8x32xf32>
    %37 = tpu.matmul %35, %36, %cst_20 {dimension_numbers = #tpu.dot_dimension_numbers<[1], [0], [0], [1], [0, 0, 1, 1], [], []>} : vector<8x32xf32>, vector<32x32xf32>, vector<8x32xf32> -> vector<8x32xf32>
    %c0_21 = arith.constant 0 : index
    %c0_22 = arith.constant 0 : index
    %38 = vector.load %arg7[%c0_21, %c0_22] : memref<1x32xf32, #tpu.memory_space<vmem>>, vector<1x32xf32>
    %39 = vector.broadcast %38 : vector<1x32xf32> to vector<8x32xf32>
    %40 = arith.addf %37, %39 : vector<8x32xf32>
    %cst_23 = arith.constant dense<0.000000e+00> : vector<32xf32>
    %41 = vector.multi_reduction <add>, %40, %cst_23 [0] : vector<8x32xf32> to vector<32xf32>
    %42 = vector.shape_cast %41 : vector<32xf32> to vector<1x32xf32>
    %cst_24 = arith.constant 8.000000e+00 : f32
    %43 = vector.broadcast %cst_24 : f32 to vector<1x32xf32>
    %44 = arith.divf %42, %43 : vector<1x32xf32>
    %45 = arith.mulf %40, %40 : vector<8x32xf32>
    %cst_25 = arith.constant dense<0.000000e+00> : vector<32xf32>
    %46 = vector.multi_reduction <add>, %45, %cst_25 [0] : vector<8x32xf32> to vector<32xf32>
    %47 = vector.shape_cast %46 : vector<32xf32> to vector<1x32xf32>
    %cst_26 = arith.constant 8.000000e+00 : f32
    %48 = vector.broadcast %cst_26 : f32 to vector<1x32xf32>
    %49 = arith.divf %47, %48 : vector<1x32xf32>
    %50 = arith.mulf %44, %44 : vector<1x32xf32>
    %51 = arith.subf %49, %50 : vector<1x32xf32>
    %cst_27 = arith.constant 0.000000e+00 : f32
    %52 = vector.broadcast %cst_27 : f32 to vector<1x32xf32>
    %53 = arith.maximumf %51, %52 : vector<1x32xf32>
    %54 = vector.broadcast %44 : vector<1x32xf32> to vector<8x32xf32>
    %55 = arith.subf %40, %54 : vector<8x32xf32>
    %cst_28 = arith.constant 9.99999974E-6 : f32
    %56 = vector.broadcast %cst_28 : f32 to vector<1x32xf32>
    %57 = arith.addf %53, %56 : vector<1x32xf32>
    %58 = math.rsqrt %57 : vector<1x32xf32>
    %59 = vector.broadcast %58 : vector<1x32xf32> to vector<8x32xf32>
    %60 = arith.mulf %55, %59 : vector<8x32xf32>
    %c0_29 = arith.constant 0 : index
    %c0_30 = arith.constant 0 : index
    %61 = vector.load %arg8[%c0_29, %c0_30] : memref<1x32xf32, #tpu.memory_space<vmem>>, vector<1x32xf32>
    %62 = vector.broadcast %61 : vector<1x32xf32> to vector<8x32xf32>
    %63 = arith.mulf %60, %62 : vector<8x32xf32>
    %c0_31 = arith.constant 0 : index
    %c0_32 = arith.constant 0 : index
    %64 = vector.load %arg9[%c0_31, %c0_32] : memref<1x32xf32, #tpu.memory_space<vmem>>, vector<1x32xf32>
    %65 = vector.broadcast %64 : vector<1x32xf32> to vector<8x32xf32>
    %66 = arith.addf %63, %65 : vector<8x32xf32>
    %cst_33 = arith.constant 0.000000e+00 : f32
    %67 = vector.broadcast %cst_33 : f32 to vector<8x32xf32>
    %68 = arith.maximumf %66, %67 : vector<8x32xf32>
    %c0_34 = arith.constant 0 : index
    %c0_35 = arith.constant 0 : index
    %69 = vector.load %arg10[%c0_34, %c0_35] : memref<8x32xf32, #tpu.memory_space<vmem>>, vector<8x32xf32>
    %70 = arith.mulf %68, %69 : vector<8x32xf32>
    %c0_36 = arith.constant 0 : index
    %c0_37 = arith.constant 0 : index
    %71 = vector.load %arg11[%c0_36, %c0_37] : memref<32x4xf32, #tpu.memory_space<vmem>>, vector<32x4xf32>
    %cst_38 = arith.constant dense<0.000000e+00> : vector<8x4xf32>
    %72 = tpu.matmul %70, %71, %cst_38 {dimension_numbers = #tpu.dot_dimension_numbers<[1], [0], [0], [1], [0, 0, 1, 1], [], []>} : vector<8x32xf32>, vector<32x4xf32>, vector<8x4xf32> -> vector<8x4xf32>
    %c0_39 = arith.constant 0 : index
    %c0_40 = arith.constant 0 : index
    %73 = vector.load %arg12[%c0_39, %c0_40] : memref<1x4xf32, #tpu.memory_space<vmem>>, vector<1x4xf32>
    %74 = vector.broadcast %73 : vector<1x4xf32> to vector<8x4xf32>
    %75 = arith.addf %72, %74 : vector<8x4xf32>
    %76 = tpu.iota {dimensions = array<i32: 1>} : vector<8x4xi32>
    %c0_i32 = arith.constant 0 : i32
    %77 = vector.broadcast %c0_i32 : i32 to vector<8x4xi32>
    %78 = arith.cmpi eq, %76, %77 : vector<8x4xi32>
    %cst_41 = arith.constant 0.000000e+00 : f32
    %79 = vector.broadcast %cst_41 : f32 to vector<8x4xf32>
    %80 = arith.maximumf %75, %79 : vector<8x4xf32>
    %81 = arith.select %78, %80, %75 : vector<8x4xi1>, vector<8x4xf32>
    %c0_42 = arith.constant 0 : index
    %c0_43 = arith.constant 0 : index
    %82 = vector.load %arg13[%c0_42, %c0_43] : memref<8x4xf32, #tpu.memory_space<vmem>>, vector<8x4xf32>
    tpu.vector_store %arg13[%c0_42, %c0_43], %81 {strides = array<i32>} : memref<8x4xf32, #tpu.memory_space<vmem>>, vector<8x4xf32>,
    return
  }
}

</mosaic_0001>

<bundles_post_ra>
// kernel: simple_neural_network_forward.3
= control target key start
LH: loop header
LB: loop body
LE: loop exit
PB: predicated region body
PF: predicated region fallthrough
CT: control target
= control target key end

     0   :  { %v469_v0 = vmov 0.0|0.0   ;;  %vm470_vm0 = vmmov 0   ;;  %v471_v3 = vmov 0.0   ;;  %vm54_vm1 = vcmask 130048   ;;  %s616_s1 = inlined_call_operand.vmem [shape: f32[16,32], index: 1, kind: input, shape index: {}]   ;;  %s617_s0 = inlined_call_operand.vmem [shape: f32[8,16], index: 0, kind: input, shape index: {}]   ;;  %s618_s6 = inlined_call_operand.vmem [shape: f32[32,32], index: 6, kind: input, shape index: {}]   ;;  %s619_s2 = inlined_call_operand.vmem [shape: f32[1,32], index: 2, kind: input, shape index: {}]   ;;  %s620_s3 = inlined_call_operand.vmem [shape: f32[1,32], index: 3, kind: input, shape index: {}]   ;;  %s621_s4 = inlined_call_operand.vmem [shape: f32[1,32], index: 4, kind: input, shape index: {}]   ;;  %s622_s5 = inlined_call_operand.vmem [shape: f32[8,32], index: 5, kind: input, shape index: {}]   ;;  %s623_s11 = inlined_call_operand.vmem [shape: f32[32,4], index: 11, kind: input, shape index: {}]   ;;  %s624_s7 = inlined_call_operand.vmem [shape: f32[1,32], index: 7, kind: input, shape index: {}]   ;;  %s625_s8 = inlined_call_operand.vmem [shape: f32[1,32], index: 8, kind: input, shape index: {}]   ;;  %s626_s9 = inlined_call_operand.vmem [shape: f32[1,32], index: 9, kind: input, shape index: {}]   ;;  %s627_s10 = inlined_call_operand.vmem [shape: f32[8,32], index: 10, kind: input, shape index: {}]   ;;  %s628_s12 = inlined_call_operand.vmem [shape: f32[1,4], index: 12, kind: input, shape index: {}]   ;;  %s629_s13 = inlined_call_operand.vmem [shape: f32[8,4], index: 13, kind: output, shape index: {}]  }
   0x1   :  { %447 = vmatprep.subr.bf16.mxu0 %v469_v0  ;;  %v45_v1 = vld [vmem:[%s616_s1] sm:$0xff]  ;;  %v46_v2 = vld [vmem:[%s616_s1 + $0x8] sm:$0xff]  ;;  %422 = vmatprep.mubr.msk.f32.mxu0 %vm470_vm0, %v471_v3  ;;  %v175_v9 = vld [vmem:[%s618_s6 + $0x10] sm:$0xff]  ;;  %vm128_vm2 = vcmask 261120   ;;  %vm389_vm4 = vcmask 31744  }
   0x2   :  { %v448_v4 = vpack.c.bf16 %v46_v2, %v45_v1  ;;  %450 = vmatprep.subr.bf16.mxu1 %v469_v0  ;;  %433 = vmatprep.mubr.msk.f32.mxu1 %vm470_vm0, %v471_v3  ;;  %v44_v5 = vld [vmem:[%s617_s0] sm:$0xff]  ;;  %v174_v7 = vld [vmem:[%s618_s6 + $0x8] sm:$0xff]  ;;  %v176_v10 = vld [vmem:[%s618_s6 + $0x18] sm:$0xff] }
   0x3   :  { %v173_v6 = vld [vmem:[%s618_s6] sm:$0xff]  ;;  %v454_v11 = vpack.c.bf16 %v176_v10, %v175_v9  ;;  %v301_v48 = vld [vmem:[%s623_s11 + $0x8] sm:$0xff]  ;;  %v302_v50 = vld [vmem:[%s623_s11 + $0x10] sm:$0xff] }
   0x4   :  { %449 = vmatpush3.bf16.msra.mxu0 %v448_v4  ;;  %v451_v8 = vpack.c.bf16 %v174_v7, %v173_v6  ;;  %v395_v12 = vld [vmem:[%s619_s2] ss:$0 sm:$0xff]  ;;  %v303_v51 = vld [vmem:[%s623_s11 + $0x18] sm:$0xff] }
   0x5   :  { %456 = vmatprep.subr.bf16.mxu0 %v469_v0  ;;  %v397_v39 = vld [vmem:[%s620_s3] ss:$0 sm:$0xff]  ;;  %v460_v52 = vpack.c.bf16 %v303_v51, %v302_v50 }
   0x6   :  { %452 = vmatpush3.bf16.msra.mxu1 %v451_v8  ;;  %v398_v41 = vld [vmem:[%s621_s4] ss:$0 sm:$0xff] }
   0x7   :  { %423 = vmatmul.mubr.msk.f32.vlgmr.msra.gmra.mrb[0].mxu0 %vm54_vm1, %v44_v5  ;;  %453 = vmatprep.subr.bf16.mxu1 %v469_v0  ;;  %v171_v44 = vld [vmem:[%s622_s5] sm:$0xff] }
   0x8   :  { %444 = vmatprep.mubr.msk.f32.mxu0 %vm470_vm0, %v471_v3  ;;  %v300_v47 = vld [vmem:[%s623_s11] sm:$0xff] }
   0x9   :  { %v457_v49 = vpack.c.bf16 %v301_v48, %v300_v47  ;;  %v399_v53 = vld [vmem:[%s624_s7] ss:$0 sm:$0xff] }
   0xa   :  { %455 = vmatpush3.bf16.msra.mxu1 %v454_v11 }
   0xb   :  { %458 = vmatpush3.bf16.msra.mxu0 %v457_v49 }
   0xc   :  { %459 = vmatprep.subr.bf16.mxu0 %v469_v0 }
   0xf   :  { %461 = vmatpush3.bf16.msra.mxu0 %v460_v52 }
  0xda   :  { %v124_v13 = vpop.f32.mrb[0].mxu0 }
  0xdb   :  { %v125_v14 = vadd.f32 %v395_v12, %v124_v13  ;;  %v424_v15 = vpop.f32.mrb[1].mxu0 }
  0xdd   :  { %v129_v16 = vsel %vm128_vm2, %v125_v14, 0.0  ;;  %v138_v17 = vmul.f32 %v125_v14, %v125_v14 }
  0xde   :  { %v130_v18 = vrot.slane %v129_v16, 4 }
  0xdf   :  { %v139_v19 = vsel %vm128_vm2, %v138_v17, 0.0 }
  0xe0   :  { %v131_v20 = vadd.f32 %v130_v18, %v129_v16  ;;  %v140_v21 = vrot.slane %v139_v19, 4  ;;  %v401_v16 = vld [vmem:[%s625_s8] ss:$0 sm:$0xff] }
  0xe1   :  { %v402_v18 = vld [vmem:[%s626_s9] ss:$0 sm:$0xff] }
  0xe2   :  { %v132_v22 = vrot.slane %v131_v20, 2  ;;  %v141_v23 = vadd.f32 %v140_v21, %v139_v19  ;;  %v298_v21 = vld [vmem:[%s627_s10] sm:$0xff] }
  0xe4   :  { %v133_v24 = vadd.f32 %v132_v22, %v131_v20  ;;  %v142_v25 = vrot.slane %v141_v23, 2 }
  0xe6   :  { %v134_v26 = vrot.slane %v133_v24, 1  ;;  %v143_v27 = vadd.f32 %v142_v25, %v141_v23  ;;  %v403_v25 = vld [vmem:[%s628_s12] ss:$0 sm:$0xff] }
  0xe8   :  { %v135_v28 = vadd.f32 %v134_v26, %v133_v24  ;;  %v144_v29 = vrot.slane %v143_v27, 1  ;;  %v384_v24 = vlaneseq }
  0xea   :  { %v137_v30 = vmul.f32 0.125, %v135_v28  ;;  %v145_v31 = vadd.f32 %v144_v29, %v143_v27  ;;  %v385_v26 = vand.u32 127, %v384_v24 }
  0xec   :  { %v146_v32 = vmul.f32 0.125, %v145_v31  ;;  %v147_v33 = vmul.f32 %v137_v30, %v137_v30  ;;  %v150_v37 = vsub.f32 %v125_v14, %v137_v30  ;;  %vm386_vm3 = vcmp.eq.s32.totalorder %v385_v26, 0 }
  0xee   :  { %v148_v34 = vsub.f32 %v146_v32, %v147_v33 }
  0xf0   :  { %v149_v35 = vmax.f32 %v148_v34, 0.0 }
  0xf2   :  { %v151_v36 = vadd.f32 1e-05, %v149_v35 }
  0xf4   :  { %465 = vrsqrt.f32 %v151_v36 }
  0xfe   :  { %v466_v38 = vpop.eup %465 }
  0xff   :  { %v153_v40 = vmul.f32 %v466_v38, %v150_v37 }
 0x101   :  { %v161_v42 = vmul.f32 %v397_v39, %v153_v40 }
 0x103   :  { %v169_v43 = vadd.f32 %v398_v41, %v161_v42 }
 0x105   :  { %v170_v45 = vmax.f32 %v169_v43, 0.0 }
 0x107   :  { %v172_v46 = vmul.f32 %v171_v44, %v170_v45 }
 0x109   :  { %434 = vmatmul.mubr.msk.f32.vlgmr.msra.gmra.mrb[0].mxu1 %vm128_vm2, %v172_v46 }
 0x1dc   :  { %v253_v54 = vpop.f32.mrb[0].mxu1 }
 0x1dd   :  { %v254_v55 = vadd.f32 %v399_v53, %v253_v54  ;;  %v435_v56 = vpop.f32.mrb[1].mxu1 }
 0x1df   :  { %v257_v57 = vsel %vm128_vm2, %v254_v55, 0.0  ;;  %v265_v58 = vmul.f32 %v254_v55, %v254_v55 }
 0x1e0   :  { %v258_v59 = vrot.slane %v257_v57, 4 }
 0x1e1   :  { %v266_v60 = vsel %vm128_vm2, %v265_v58, 0.0 }
 0x1e2   :  { %v259_v61 = vadd.f32 %v258_v59, %v257_v57  ;;  %v267_v62 = vrot.slane %v266_v60, 4 }
 0x1e4   :  { %v260_v63 = vrot.slane %v259_v61, 2  ;;  %v268_v0 = vadd.f32 %v267_v62, %v266_v60 }
 0x1e6   :  { %v261_v1 = vadd.f32 %v260_v63, %v259_v61  ;;  %v269_v2 = vrot.slane %v268_v0, 2 }
 0x1e8   :  { %v262_v3 = vrot.slane %v261_v1, 1  ;;  %v270_v4 = vadd.f32 %v269_v2, %v268_v0 }
 0x1ea   :  { %v263_v5 = vadd.f32 %v262_v3, %v261_v1  ;;  %v271_v6 = vrot.slane %v270_v4, 1 }
 0x1ec   :  { %v264_v7 = vmul.f32 0.125, %v263_v5  ;;  %v272_v8 = vadd.f32 %v271_v6, %v270_v4 }
 0x1ee   :  { %v273_v9 = vmul.f32 0.125, %v272_v8  ;;  %v274_v10 = vmul.f32 %v264_v7, %v264_v7  ;;  %v277_v14 = vsub.f32 %v254_v55, %v264_v7 }
 0x1f0   :  { %v275_v11 = vsub.f32 %v273_v9, %v274_v10 }
 0x1f2   :  { %v276_v12 = vmax.f32 %v275_v11, 0.0 }
 0x1f4   :  { %v278_v13 = vadd.f32 1e-05, %v276_v12 }
 0x1f6   :  { %467 = vrsqrt.f32 %v278_v13 }
 0x200   :  { %v468_v15 = vpop.eup %467 }
 0x201   :  { %v280_v17 = vmul.f32 %v468_v15, %v277_v14 }
 0x203   :  { %v288_v19 = vmul.f32 %v401_v16, %v280_v17 }
 0x205   :  { %v296_v20 = vadd.f32 %v402_v18, %v288_v19 }
 0x207   :  { %v297_v22 = vmax.f32 %v296_v20, 0.0 }
 0x209   :  { %v299_v23 = vmul.f32 %v298_v21, %v297_v22 }
 0x20b   :  { %445 = vmatmul.mubr.msk.f32.vlgmr.msra.gmra.mrb[2].mxu0 %vm128_vm2, %v299_v23 }
 0x2de   :  { %v380_v27 = vpop.f32.mrb[2].mxu0 }
 0x2df   :  { %v381_v28 = vadd.f32 %v403_v25, %v380_v27  ;;  %v446_v29 = vpop.f32.mrb[3].mxu0 }
 0x2e1   :  { %v387_v30 = vmax.f32 %v381_v28, 0.0 }
 0x2e3   :  { %v388_v31 = vsel %vm386_vm3, %v387_v30, %v381_v28 }
 0x2e4   :  { %390 = vst.msk [vmem:[%s629_s13] sm:$0xff] %vm389_vm4, %v388_v31 }

</bundles_post_ra>
